<compile_context>
chip_gen: v5e
topology: v5e:2x2
jax: 0.10.0
libtpu: 0.0.40
codegen_flags: <defaults>
</compile_context>

<pallas_src>
import jax
import jax.numpy as jnp
from jax.experimental import pallas as pl
from jax.experimental.pallas import tpu as pltpu


def _copy_kernel(x_ref, o_ref):
    # Pure data movement: lane-dense tile copy, no relayout in VMEM.
    o_ref[...] = x_ref[...]


def _pick_divisor_le(size: int, base: int, cap: int) -> int:
    """Largest d with d % base == 0, d | size, d <= cap.  Requires base | size."""
    cap = max(base, min(size, cap))
    d = (cap // base) * base
    while d > base:
        if size % d == 0:
            return d
        d -= base
    return base


def _pick_extent(size: int, align: int, cap: int) -> int:
    """Tile extent for one axis.

    Preference order: full extent if it fits the cap (always layout-legal);
    else the largest divisor of `size` that is a multiple of `align` and
    <= cap (no masked trailing block); else the largest multiple of `align`
    <= cap (trailing block masked by Pallas).
    """
    cap = max(align, min(size, cap))
    if size <= cap:
        return size
    d = (cap // align) * align
    while d >= align:
        if size % d == 0:
            return d
        d -= align
    return (cap // align) * align


def flatten(x: jax.Array) -> jax.Array:
    """x: (N, ...) -> (N, prod(rest)), equivalent to torch x.view(x.size(0), -1)."""
    n = x.shape[0]
    flat = 1
    for d in x.shape[1:]:
        flat *= d
    total = n * flat
    itemsize = jnp.dtype(x.dtype).itemsize

    if total == 0:
        # Nothing to copy; the view itself is the answer.
        return jnp.reshape(x, (n, flat))

    # Dtype-aware sublane granularity: 8 (f32), 16 (bf16/f16), 32 (int8/fp8).
    sub_align = 8 * max(1, 4 // itemsize)

    # Generation-aware byte budgets from the chip's real VMEM capacity.
    try:
        info = pltpu.get_tpu_info()
        vmem_cap = int(getattr(info, "vmem_capacity_bytes", 64 << 20))
    except Exception:
        vmem_cap = 64 << 20  # conservative fallback (v7x-sized)
    # v7x (64 MiB VMEM) -> 8 MiB blocks; v5e/v6e (128 MiB) -> 16 MiB blocks.
    block_bytes = min(16 << 20, max(1 << 20, vmem_cap // 8))
    # in + out, double-buffered = 4x block; leave headroom for Mosaic scratch.
    vmem_limit = min(vmem_cap * 3 // 4, 6 * block_bytes)

    # Blocking shape (R, L), decoupled from the logical (n, flat).  Row-major
    # element order is preserved, so reshape -> copy -> reshape is exact.
    if total % 128 == 0:
        lane_cap = min(8192, max(128, block_bytes // (sub_align * itemsize)))
        if total // sub_align >= 128:
            # Keep at least sub_align rows so blocks have full sublanes.
            lane_cap = min(lane_cap, ((total // sub_align) // 128) * 128)
        lane_cap = max(128, lane_cap)
        L = _pick_divisor_le(total, 128, lane_cap)
        R = total // L
    else:
        # Odd total: fall back to the logical shape (full-extent blocks when
        # small; masked trailing blocks otherwise).  Correctness unaffected.
        R, L = n, flat

    # Tile extents from the byte budget (divisor-preferring, unmasked).
    tf_cap = max(128, min(L, block_bytes // (max(1, min(R, sub_align)) * itemsize), 1 << 14))
    tf = _pick_extent(L, 128, tf_cap)
    tb_cap = max(sub_align, min(R, block_bytes // (tf * itemsize), 1 << 14))
    tb = _pick_extent(R, sub_align, tb_cap)

    grid = (pl.cdiv(R, tb), pl.cdiv(L, tf))

    x2d = x.reshape(R, L)  # metadata-only for contiguous row-major input

    out2d = pl.pallas_call(
        _copy_kernel,
        out_shape=jax.ShapeDtypeStruct((R, L), x.dtype),
        grid_spec=pltpu.PrefetchScalarGridSpec(
            num_scalar_prefetch=0,
            grid=grid,
            in_specs=[pl.BlockSpec((tb, tf), lambda i, j: (i, j))],
            out_specs=pl.BlockSpec((tb, tf), lambda i, j: (i, j)),
        ),
        # Flatten is logically zero-copy: donate/alias the input HBM buffer.
        input_output_aliases={0: 0},
        compiler_params=pltpu.CompilerParams(
            dimension_semantics=("parallel", "parallel"),
            vmem_limit_bytes=int(vmem_limit),
        ),
        cost_estimate=pl.CostEstimate(
            flops=0,
            transcendentals=0,
            bytes_accessed=2 * total * itemsize,
        ),
    )(x2d)

    return out2d.reshape(n, flat)  # metadata-only


if __name__ == "__main__":
    key = jax.random.PRNGKey(0)
    # Small NCHW input consistent with the module's forward pass.
    x = jax.random.normal(key, (2, 4, 16, 16), dtype=jnp.float32)

    out = flatten(x)
    out = jax.block_until_ready(out)

    # Correctness check against plain-JAX reference of torch's view semantics.
    ref = x.reshape(x.shape[0], -1)
    assert out.shape == ref.shape, (out.shape, ref.shape)
    assert out.dtype == ref.dtype, (out.dtype, ref.dtype)
    assert bool(jnp.array_equal(out, ref)), "mismatch vs reference flatten"

    print("KERNEL_OK")
</pallas_src>

<mosaic_0001>
module attributes {stable_mosaic.version = 11 : i64} {
  func.func @_copy_kernel(%arg0: i32, %arg1: i32, %arg2: memref<8x256xf32, #tpu.memory_space<vmem>>, %arg3: memref<8x256xf32, #tpu.memory_space<vmem>>) attributes {dimension_semantics = [#tpu.dimension_semantics<parallel>, #tpu.dimension_semantics<parallel>], iteration_bounds = array<i64: 1, 1>, scalar_prefetch = 0 : i64, scratch_operands = 0 : i64, tpu.core_type = #tpu.core_type<tc>, window_params = [{transform_indices = @transform_0, window_bounds = array<i64: 8, 256>}, {transform_indices = @transform_1, window_bounds = array<i64: 8, 256>}]} {
    %c0 = arith.constant 0 : index
    %c0_0 = arith.constant 0 : index
    %0 = vector.load %arg2[%c0, %c0_0] : memref<8x256xf32, #tpu.memory_space<vmem>>, vector<8x256xf32>
    %c0_1 = arith.constant 0 : index
    %c0_2 = arith.constant 0 : index
    %1 = vector.load %arg3[%c0_1, %c0_2] : memref<8x256xf32, #tpu.memory_space<vmem>>, vector<8x256xf32>
    tpu.vector_store %arg3[%c0_1, %c0_2], %0 {strides = array<i32>} : memref<8x256xf32, #tpu.memory_space<vmem>>, vector<8x256xf32>,
    return
  }
  func.func @transform_0(%arg0: i32, %arg1: i32) -> (i32, i32) {
    %c0_i32 = arith.constant 0 : i32
    return %arg0, %arg1 : i32, i32
  }
  func.func @transform_1(%arg0: i32, %arg1: i32) -> (i32, i32) {
    %c0_i32 = arith.constant 0 : i32
    return %arg0, %arg1 : i32, i32
  }
}

</mosaic_0001>

<bundles_post_ra>
// kernel: tpu_custom_call.1
= control target key start
LH: loop header
LB: loop body
LE: loop exit
PB: predicated region body
PF: predicated region fallthrough
CT: control target
= control target key end

     0   :  { %6 = vsyncpa [#allocation3], 0  ;;  %s116_s0 = inlined_call_operand.hbm [shape: f32[8,256], index: 0, kind: input, shape index: {}, may-alias: {0,1}]   ;;  %s117_s1 = inlined_call_operand.hbm [shape: f32[8,256], index: 1, kind: output, shape index: {}, may-alias: {0,1}]  }
   0x1   :  { %7 = vsyncpa [#allocation4], 0  ;;  %s13_s8 = sshll.u32 %s116_s0, 4  ;;  %s98_s9 = smov [#allocation2]   ;;  %s14_s8 = int_to_ptr.hbm [resolvable:$true] %s13_s8 }
   0x2   :  { %s15_s10 = sshll.u32 %s98_s9, 4  ;;  %s16_s10 = int_to_ptr.vmem [resolvable:$true] %s15_s10 }
   0x3   :  { %18 = dma.hbm_to_vmem [thread:$0]  %s14_s8, 256, %s16_s10, [#allocation3]  }
   0x4   :  { %94 = dma.done.wait [#allocation3], 256  }
   0x5   :  { %95 = vsyncadd [#allocation3], 4294967040  ;;  %s99_s11 = smov [#allocation5]   ;;  %s34_s15 = sshll.u32 %s117_s1, 4  ;;  %v23_v0 = vld [vmem:[#allocation2] sm:$0xff]  ;;  %v24_v1 = vld [vmem:[#allocation2 + $0x8] sm:$0xff]  ;;  %s35_s15 = int_to_ptr.hbm [resolvable:$true] %s34_s15 }
   0x6   :  { %s32_s12 = sshll.u32 %s99_s11, 4  ;;  %25 = vst [vmem:[#allocation5] sm:$0xff] %v23_v0  ;;  %s33_s12 = int_to_ptr.vmem [resolvable:$true] %s32_s12 }
   0x7   :  { %26 = vst [vmem:[#allocation5 + $0x8] sm:$0xff] %v24_v1 }
   0x8   :  { %37 = dma.vmem_to_hbm [thread:$0]  %s33_s12, 256, %s35_s15, [#allocation4]  }
   0x9   :  { %96 = dma.done.wait [#allocation4], 256  }
   0xa   :  { %97 = vsyncadd [#allocation4], 4294967040 }
   0xb   :  { %42 = vsyncpa [#allocation3], 1 }
   0xc   :  { %43 = vsyncpa [#allocation4], 1 }

</bundles_post_ra>
